<compile_context>
chip_gen: v7x
topology: tpu7x:2x2x1
jax: 0.10.0
libtpu: 0.0.40
codegen_flags: <defaults>
</compile_context>

<pallas_src>
import functools

import jax
import jax.numpy as jnp
import numpy as np
from jax.experimental import pallas as pl
from jax.experimental.pallas import tpu as pltpu


def _decoder_kernel(enc_ref, x_ref, w1a_ref, w1b_ref, b1_ref,
                    w2_ref, b2_ref, w3mu_ref, b3mu_ref, w3s_ref, b3s_ref,
                    mu_ref, sigma_ref):
    # h^T [H, tile_m] = W1a[H,E] @ enc^T[E,tile_m] + W1b[H,Dx] @ x^T[Dx,tile_m] + b1
    h = (jnp.dot(w1a_ref[...], enc_ref[...], preferred_element_type=jnp.float32)
         + jnp.dot(w1b_ref[...], x_ref[...], preferred_element_type=jnp.float32)
         + b1_ref[...])
    h = jnp.maximum(h, 0.0)

    # hidden Linear + ReLU (depth - 2 == 1 for depth=3)
    h = jnp.dot(w2_ref[...], h, preferred_element_type=jnp.float32) + b2_ref[...]
    h = jnp.maximum(h, 0.0)

    # final Linear, pre-split into mu / sigma heads (lane-aligned, no slicing)
    mu = jnp.dot(w3mu_ref[...], h, preferred_element_type=jnp.float32) + b3mu_ref[...]
    sraw = jnp.dot(w3s_ref[...], h, preferred_element_type=jnp.float32) + b3s_ref[...]

    # numerically-stable softplus: max(x,0) + log1p(exp(-|x|))
    softplus = jnp.maximum(sraw, 0.0) + jnp.log1p(jnp.exp(-jnp.abs(sraw)))

    mu_ref[...] = mu.astype(mu_ref.dtype)
    sigma_ref[...] = (0.1 + 0.9 * softplus).astype(sigma_ref.dtype)


@functools.partial(jax.jit, static_argnames=("tile_m",))
def decoder_forward(encoded, x, params, tile_m=None):
    """encoded: [B, Nt, E]; x: [B, Nt, Dx] -> (mu, sigma) each [B, Nt, Dy]."""
    w1, b1, w2, b2, w3, b3 = params
    B, Nt, E = encoded.shape
    Dx = x.shape[-1]
    H = w1.shape[1]
    Dy = w3.shape[1] // 2
    M = B * Nt

    if tile_m is None:
        # lane-dense tiles: single grid step for small M, up to 512 rows/step
        # for large M (keeps per-step overhead amortized, VMEM use ~150 KiB).
        tile_m = min(512, pl.cdiv(M, 128) * 128)
    M_pad = pl.cdiv(M, tile_m) * tile_m

    # layout plumbing (cheap, under jit): transpose activations so M is the
    # lane axis; zero-pad the ragged tail instead of asserting divisibility.
    enc_t = encoded.reshape(M, E).T            # [E, M]
    x_t = x.reshape(M, Dx).T                   # [Dx, M]
    if M_pad != M:
        pad = M_pad - M
        enc_t = jnp.pad(enc_t, ((0, 0), (0, pad)))
        x_t = jnp.pad(x_t, ((0, 0), (0, pad)))

    # kernel-layout params: weights as (out, in), W1 split across the concat
    # boundary, W3/b3 split into mu / sigma heads, biases as columns.
    w1a = w1[:E, :].T                          # [H, E]
    w1b = w1[E:, :].T                          # [H, Dx]
    b1c = b1.reshape(H, 1)
    w2t = w2.T                                 # [H, H]
    b2c = b2.reshape(H, 1)
    w3mu = w3[:, :Dy].T                        # [Dy, H]
    w3s = w3[:, Dy:].T                         # [Dy, H]
    b3mu = b3[:Dy].reshape(Dy, 1)
    b3s = b3[Dy:].reshape(Dy, 1)

    grid = (M_pad // tile_m,)
    mu_t, sigma_t = pl.pallas_call(
        _decoder_kernel,
        out_shape=(jax.ShapeDtypeStruct((Dy, M_pad), jnp.float32),
                   jax.ShapeDtypeStruct((Dy, M_pad), jnp.float32)),
        grid_spec=pl.GridSpec(
            grid=grid,
            in_specs=[
                pl.BlockSpec((E, tile_m), lambda i: (0, i)),    # enc^T tile
                pl.BlockSpec((Dx, tile_m), lambda i: (0, i)),   # x^T tile
                pl.BlockSpec((H, E), lambda i: (0, 0)),         # W1a (resident)
                pl.BlockSpec((H, Dx), lambda i: (0, 0)),        # W1b
                pl.BlockSpec((H, 1), lambda i: (0, 0)),         # b1
                pl.BlockSpec((H, H), lambda i: (0, 0)),         # W2
                pl.BlockSpec((H, 1), lambda i: (0, 0)),         # b2
                pl.BlockSpec((Dy, H), lambda i: (0, 0)),        # W3_mu
                pl.BlockSpec((Dy, 1), lambda i: (0, 0)),        # b3_mu
                pl.BlockSpec((Dy, H), lambda i: (0, 0)),        # W3_sigma
                pl.BlockSpec((Dy, 1), lambda i: (0, 0)),        # b3_sigma
            ],
            out_specs=(
                pl.BlockSpec((Dy, tile_m), lambda i: (0, i)),   # mu^T
                pl.BlockSpec((Dy, tile_m), lambda i: (0, i)),   # sigma^T
            ),
        ),
        compiler_params=pltpu.CompilerParams(
            dimension_semantics=("parallel",)),
    )(enc_t, x_t, w1a, w1b, b1c, w2t, b2c, w3mu, b3mu, w3s, b3s)

    mu = mu_t[:, :M].T.reshape(B, Nt, Dy)
    sigma = sigma_t[:, :M].T.reshape(B, Nt, Dy)
    return mu, sigma


def init_params(key, dim_x, dim_y, dim_enc, dim_hid):
    """Deterministic synthetic init. Weights stored as (in, out), biases 1-D."""
    k1, k2, k3, k4, k5, k6 = jax.random.split(key, 6)
    din = dim_enc + dim_x
    scale = 0.1
    w1 = scale * jax.random.normal(k1, (din, dim_hid), jnp.float32)
    b1 = scale * jax.random.normal(k2, (dim_hid,), jnp.float32)
    w2 = scale * jax.random.normal(k3, (dim_hid, dim_hid), jnp.float32)
    b2 = scale * jax.random.normal(k4, (dim_hid,), jnp.float32)
    w3 = scale * jax.random.normal(k5, (dim_hid, 2 * dim_y), jnp.float32)
    b3 = scale * jax.random.normal(k6, (2 * dim_y,), jnp.float32)
    return (w1, b1, w2, b2, w3, b3)


def reference_forward(encoded, x, params):
    """Pure-JAX reference mirroring the PyTorch module (ctx=None)."""
    w1, b1, w2, b2, w3, b3 = params
    packed = jnp.concatenate([encoded, x], axis=-1)
    h = jnp.maximum(packed @ w1 + b1, 0.0)
    h = jnp.maximum(h @ w2 + b2, 0.0)
    out = h @ w3 + b3
    dy = out.shape[-1] // 2
    mu, sraw = out[..., :dy], out[..., dy:]
    sigma = 0.1 + 0.9 * jax.nn.softplus(sraw)
    return mu, sigma


if __name__ == "__main__":
    # small shapes consistent with the module:
    # dim_x=1, dim_y=1, dim_enc=32, dim_hid=32, depth=3, B=2, Nt=8
    B, Nt = 2, 8
    dim_x, dim_y, dim_enc, dim_hid = 1, 1, 32, 32

    key = jax.random.PRNGKey(0)
    k_enc, k_x, k_par = jax.random.split(key, 3)
    encoded = jax.random.normal(k_enc, (B, Nt, dim_enc), jnp.float32)
    x = jax.random.normal(k_x, (B, Nt, dim_x), jnp.float32)
    params = init_params(k_par, dim_x, dim_y, dim_enc, dim_hid)

    mu, sigma = decoder_forward(encoded, x, params)
    jax.block_until_ready((mu, sigma))

    mu_ref, sigma_ref = reference_forward(encoded, x, params)
    np.testing.assert_allclose(np.asarray(mu), np.asarray(mu_ref),
                               rtol=1e-5, atol=1e-5)
    np.testing.assert_allclose(np.asarray(sigma), np.asarray(sigma_ref),
                               rtol=1e-5, atol=1e-5)
    assert mu.shape == (B, Nt, dim_y) and sigma.shape == (B, Nt, dim_y)
    assert bool(jnp.all(sigma > 0.0))

    print("KERNEL_OK")
</pallas_src>

<mosaic_0001>
module attributes {stable_mosaic.version = 11 : i64} {
  func.func @_decoder_kernel(%arg0: i32, %arg1: memref<32x128xf32, #tpu.memory_space<vmem>>, %arg2: memref<1x128xf32, #tpu.memory_space<vmem>>, %arg3: memref<32x32xf32, #tpu.memory_space<vmem>>, %arg4: memref<32x1xf32, #tpu.memory_space<vmem>>, %arg5: memref<32x1xf32, #tpu.memory_space<vmem>>, %arg6: memref<32x32xf32, #tpu.memory_space<vmem>>, %arg7: memref<32x1xf32, #tpu.memory_space<vmem>>, %arg8: memref<1x32xf32, #tpu.memory_space<vmem>>, %arg9: memref<1x1xf32, #tpu.memory_space<vmem>>, %arg10: memref<1x32xf32, #tpu.memory_space<vmem>>, %arg11: memref<1x1xf32, #tpu.memory_space<vmem>>, %arg12: memref<1x128xf32, #tpu.memory_space<vmem>>, %arg13: memref<1x128xf32, #tpu.memory_space<vmem>>) attributes {dimension_semantics = [#tpu.dimension_semantics<parallel>], iteration_bounds = array<i64: 1>, scalar_prefetch = 0 : i64, scratch_operands = 0 : i64, tpu.core_type = #tpu.core_type<tc>, window_params = [{transform_indices = @transform_0, window_bounds = array<i64: 32, 128>}, {transform_indices = @transform_1, window_bounds = array<i64: 1, 128>}, {pipeline_mode = #tpu.pipeline_mode<synchronous>, transform_indices = @transform_2, window_bounds = array<i64: 32, 32>}, {pipeline_mode = #tpu.pipeline_mode<synchronous>, transform_indices = @transform_3, window_bounds = array<i64: 32, 1>}, {pipeline_mode = #tpu.pipeline_mode<synchronous>, transform_indices = @transform_4, window_bounds = array<i64: 32, 1>}, {pipeline_mode = #tpu.pipeline_mode<synchronous>, transform_indices = @transform_5, window_bounds = array<i64: 32, 32>}, {pipeline_mode = #tpu.pipeline_mode<synchronous>, transform_indices = @transform_6, window_bounds = array<i64: 32, 1>}, {pipeline_mode = #tpu.pipeline_mode<synchronous>, transform_indices = @transform_7, window_bounds = array<i64: 1, 32>}, {pipeline_mode = #tpu.pipeline_mode<synchronous>, transform_indices = @transform_8, window_bounds = array<i64: 1, 1>}, {pipeline_mode = #tpu.pipeline_mode<synchronous>, transform_indices = @transform_9, window_bounds = array<i64: 1, 32>}, {pipeline_mode = #tpu.pipeline_mode<synchronous>, transform_indices = @transform_10, window_bounds = array<i64: 1, 1>}, {transform_indices = @transform_11, window_bounds = array<i64: 1, 128>}, {transform_indices = @transform_12, window_bounds = array<i64: 1, 128>}]} {
    %c0 = arith.constant 0 : index
    %c0_0 = arith.constant 0 : index
    %0 = vector.load %arg3[%c0, %c0_0] : memref<32x32xf32, #tpu.memory_space<vmem>>, vector<32x32xf32>
    %c0_1 = arith.constant 0 : index
    %c0_2 = arith.constant 0 : index
    %1 = vector.load %arg1[%c0_1, %c0_2] : memref<32x128xf32, #tpu.memory_space<vmem>>, vector<32x128xf32>
    %cst = arith.constant dense<0.000000e+00> : vector<32x128xf32>
    %2 = tpu.matmul %0, %1, %cst {dimension_numbers = #tpu.dot_dimension_numbers<[1], [0], [0], [1], [0, 0, 1, 1], [], []>} : vector<32x32xf32>, vector<32x128xf32>, vector<32x128xf32> -> vector<32x128xf32>
    %c0_3 = arith.constant 0 : index
    %c0_4 = arith.constant 0 : index
    %3 = vector.load %arg4[%c0_3, %c0_4] : memref<32x1xf32, #tpu.memory_space<vmem>>, vector<32x1xf32>
    %c0_5 = arith.constant 0 : index
    %c0_6 = arith.constant 0 : index
    %4 = vector.load %arg2[%c0_5, %c0_6] : memref<1x128xf32, #tpu.memory_space<vmem>>, vector<1x128xf32>
    %cst_7 = arith.constant dense<0.000000e+00> : vector<32x128xf32>
    %5 = tpu.matmul %3, %4, %cst_7 {dimension_numbers = #tpu.dot_dimension_numbers<[1], [0], [0], [1], [0, 0, 1, 1], [], []>} : vector<32x1xf32>, vector<1x128xf32>, vector<32x128xf32> -> vector<32x128xf32>
    %6 = arith.addf %2, %5 : vector<32x128xf32>
    %c0_8 = arith.constant 0 : index
    %c0_9 = arith.constant 0 : index
    %7 = vector.load %arg5[%c0_8, %c0_9] : memref<32x1xf32, #tpu.memory_space<vmem>>, vector<32x1xf32>
    %8 = vector.broadcast %7 : vector<32x1xf32> to vector<32x128xf32>
    %9 = arith.addf %6, %8 : vector<32x128xf32>
    %cst_10 = arith.constant 0.000000e+00 : f32
    %10 = vector.broadcast %cst_10 : f32 to vector<32x128xf32>
    %11 = arith.maximumf %9, %10 : vector<32x128xf32>
    %c0_11 = arith.constant 0 : index
    %c0_12 = arith.constant 0 : index
    %12 = vector.load %arg6[%c0_11, %c0_12] : memref<32x32xf32, #tpu.memory_space<vmem>>, vector<32x32xf32>
    %cst_13 = arith.constant dense<0.000000e+00> : vector<32x128xf32>
    %13 = tpu.matmul %12, %11, %cst_13 {dimension_numbers = #tpu.dot_dimension_numbers<[1], [0], [0], [1], [0, 0, 1, 1], [], []>} : vector<32x32xf32>, vector<32x128xf32>, vector<32x128xf32> -> vector<32x128xf32>
    %c0_14 = arith.constant 0 : index
    %c0_15 = arith.constant 0 : index
    %14 = vector.load %arg7[%c0_14, %c0_15] : memref<32x1xf32, #tpu.memory_space<vmem>>, vector<32x1xf32>
    %15 = vector.broadcast %14 : vector<32x1xf32> to vector<32x128xf32>
    %16 = arith.addf %13, %15 : vector<32x128xf32>
    %cst_16 = arith.constant 0.000000e+00 : f32
    %17 = vector.broadcast %cst_16 : f32 to vector<32x128xf32>
    %18 = arith.maximumf %16, %17 : vector<32x128xf32>
    %c0_17 = arith.constant 0 : index
    %c0_18 = arith.constant 0 : index
    %19 = vector.load %arg8[%c0_17, %c0_18] : memref<1x32xf32, #tpu.memory_space<vmem>>, vector<1x32xf32>
    %cst_19 = arith.constant dense<0.000000e+00> : vector<1x128xf32>
    %20 = tpu.matmul %19, %18, %cst_19 {dimension_numbers = #tpu.dot_dimension_numbers<[1], [0], [0], [1], [0, 0, 1, 1], [], []>} : vector<1x32xf32>, vector<32x128xf32>, vector<1x128xf32> -> vector<1x128xf32>
    %c0_20 = arith.constant 0 : index
    %c0_21 = arith.constant 0 : index
    %21 = vector.load %arg9[%c0_20, %c0_21] : memref<1x1xf32, #tpu.memory_space<vmem>>, vector<1x1xf32>
    %22 = vector.broadcast %21 : vector<1x1xf32> to vector<1x128xf32>
    %23 = arith.addf %20, %22 : vector<1x128xf32>
    %c0_22 = arith.constant 0 : index
    %c0_23 = arith.constant 0 : index
    %24 = vector.load %arg10[%c0_22, %c0_23] : memref<1x32xf32, #tpu.memory_space<vmem>>, vector<1x32xf32>
    %cst_24 = arith.constant dense<0.000000e+00> : vector<1x128xf32>
    %25 = tpu.matmul %24, %18, %cst_24 {dimension_numbers = #tpu.dot_dimension_numbers<[1], [0], [0], [1], [0, 0, 1, 1], [], []>} : vector<1x32xf32>, vector<32x128xf32>, vector<1x128xf32> -> vector<1x128xf32>
    %c0_25 = arith.constant 0 : index
    %c0_26 = arith.constant 0 : index
    %26 = vector.load %arg11[%c0_25, %c0_26] : memref<1x1xf32, #tpu.memory_space<vmem>>, vector<1x1xf32>
    %27 = vector.broadcast %26 : vector<1x1xf32> to vector<1x128xf32>
    %28 = arith.addf %25, %27 : vector<1x128xf32>
    %cst_27 = arith.constant 0.000000e+00 : f32
    %29 = vector.broadcast %cst_27 : f32 to vector<1x128xf32>
    %30 = arith.maximumf %28, %29 : vector<1x128xf32>
    %31 = math.absf %28 : vector<1x128xf32>
    %cst_28 = arith.constant 0.000000e+00 : f32
    %32 = vector.broadcast %cst_28 : f32 to vector<1x128xf32>
    %33 = arith.subf %32, %31 : vector<1x128xf32>
    %34 = math.exp %33 : vector<1x128xf32>
    %35 = math.log1p %34 : vector<1x128xf32>
    %36 = arith.addf %30, %35 : vector<1x128xf32>
    %c0_29 = arith.constant 0 : index
    %c0_30 = arith.constant 0 : index
    %37 = vector.load %arg12[%c0_29, %c0_30] : memref<1x128xf32, #tpu.memory_space<vmem>>, vector<1x128xf32>
    tpu.vector_store %arg12[%c0_29, %c0_30], %23 {strides = array<i32>} : memref<1x128xf32, #tpu.memory_space<vmem>>, vector<1x128xf32>,
    %cst_31 = arith.constant 0.899999976 : f32
    %38 = vector.broadcast %cst_31 : f32 to vector<1x128xf32>
    %39 = arith.mulf %38, %36 : vector<1x128xf32>
    %cst_32 = arith.constant 1.000000e-01 : f32
    %40 = vector.broadcast %cst_32 : f32 to vector<1x128xf32>
    %41 = arith.addf %40, %39 : vector<1x128xf32>
    %c0_33 = arith.constant 0 : index
    %c0_34 = arith.constant 0 : index
    %42 = vector.load %arg13[%c0_33, %c0_34] : memref<1x128xf32, #tpu.memory_space<vmem>>, vector<1x128xf32>
    tpu.vector_store %arg13[%c0_33, %c0_34], %41 {strides = array<i32>} : memref<1x128xf32, #tpu.memory_space<vmem>>, vector<1x128xf32>,
    return
  }
  func.func @transform_0(%arg0: i32) -> (i32, i32) {
    %c0_i32 = arith.constant 0 : i32
    %c0_i32_0 = arith.constant 0 : i32
    return %c0_i32, %arg0 : i32, i32
  }
  func.func @transform_1(%arg0: i32) -> (i32, i32) {
    %c0_i32 = arith.constant 0 : i32
    %c0_i32_0 = arith.constant 0 : i32
    return %c0_i32, %arg0 : i32, i32
  }
  func.func @transform_2(%arg0: i32) -> (i32, i32) {
    %c0_i32 = arith.constant 0 : i32
    %c0_i32_0 = arith.constant 0 : i32
    %c0_i32_1 = arith.constant 0 : i32
    return %c0_i32, %c0_i32_0 : i32, i32
  }
  func.func @transform_3(%arg0: i32) -> (i32, i32) {
    %c0_i32 = arith.constant 0 : i32
    %c0_i32_0 = arith.constant 0 : i32
    %c0_i32_1 = arith.constant 0 : i32
    return %c0_i32, %c0_i32_0 : i32, i32
  }
  func.func @transform_4(%arg0: i32) -> (i32, i32) {
    %c0_i32 = arith.constant 0 : i32
    %c0_i32_0 = arith.constant 0 : i32
    %c0_i32_1 = arith.constant 0 : i32
    return %c0_i32, %c0_i32_0 : i32, i32
  }
  func.func @transform_5(%arg0: i32) -> (i32, i32) {
    %c0_i32 = arith.constant 0 : i32
    %c0_i32_0 = arith.constant 0 : i32
    %c0_i32_1 = arith.constant 0 : i32
    return %c0_i32, %c0_i32_0 : i32, i32
  }
  func.func @transform_6(%arg0: i32) -> (i32, i32) {
    %c0_i32 = arith.constant 0 : i32
    %c0_i32_0 = arith.constant 0 : i32
    %c0_i32_1 = arith.constant 0 : i32
    return %c0_i32, %c0_i32_0 : i32, i32
  }
  func.func @transform_7(%arg0: i32) -> (i32, i32) {
    %c0_i32 = arith.constant 0 : i32
    %c0_i32_0 = arith.constant 0 : i32
    %c0_i32_1 = arith.constant 0 : i32
    return %c0_i32, %c0_i32_0 : i32, i32
  }
  func.func @transform_8(%arg0: i32) -> (i32, i32) {
    %c0_i32 = arith.constant 0 : i32
    %c0_i32_0 = arith.constant 0 : i32
    %c0_i32_1 = arith.constant 0 : i32
    return %c0_i32, %c0_i32_0 : i32, i32
  }
  func.func @transform_9(%arg0: i32) -> (i32, i32) {
    %c0_i32 = arith.constant 0 : i32
    %c0_i32_0 = arith.constant 0 : i32
    %c0_i32_1 = arith.constant 0 : i32
    return %c0_i32, %c0_i32_0 : i32, i32
  }
  func.func @transform_10(%arg0: i32) -> (i32, i32) {
    %c0_i32 = arith.constant 0 : i32
    %c0_i32_0 = arith.constant 0 : i32
    %c0_i32_1 = arith.constant 0 : i32
    return %c0_i32, %c0_i32_0 : i32, i32
  }
  func.func @transform_11(%arg0: i32) -> (i32, i32) {
    %c0_i32 = arith.constant 0 : i32
    %c0_i32_0 = arith.constant 0 : i32
    return %c0_i32, %arg0 : i32, i32
  }
  func.func @transform_12(%arg0: i32) -> (i32, i32) {
    %c0_i32 = arith.constant 0 : i32
    %c0_i32_0 = arith.constant 0 : i32
    return %c0_i32, %arg0 : i32, i32
  }
}

</mosaic_0001>

<bundles_post_ra>
// kernel: decoder_forward.1
= control target key start
LH: loop header
LB: loop body
LE: loop exit
PB: predicated region body
PF: predicated region fallthrough
CT: control target
= control target key end

     0   :  { %vm70_vm0 = vcmask 1040384   ;;  %vm57_vm1 = vcmask 7168   ;;  %v759_v3 = vmov 0   ;;  %vm159_vm2 = vcmask 261120   ;;  %s937_s1 = inlined_call_operand.vmem [shape: f32[1,128], index: 1, kind: input, shape index: {}]   ;;  %s938_s3 = inlined_call_operand.vmem [shape: f32[32,1], index: 3, kind: input, shape index: {}]   ;;  %s939_s0 = inlined_call_operand.vmem [shape: f32[32,128], index: 0, kind: input, shape index: {}]   ;;  %s940_s10 = inlined_call_operand.<no memory space> [shape: f32[1,1], index: 10, kind: input, shape index: {}]   ;;  %s941_s8 = inlined_call_operand.<no memory space> [shape: f32[1,1], index: 8, kind: input, shape index: {}]   ;;  %s942_s4 = inlined_call_operand.vmem [shape: f32[32,1], index: 4, kind: input, shape index: {}]   ;;  %s943_s2 = inlined_call_operand.vmem [shape: f32[32,32], index: 2, kind: input, shape index: {}]   ;;  %s944_s6 = inlined_call_operand.vmem [shape: f32[32,1], index: 6, kind: input, shape index: {}]   ;;  %s945_s5 = inlined_call_operand.vmem [shape: f32[32,32], index: 5, kind: input, shape index: {}]   ;;  %s946_s7 = inlined_call_operand.vmem [shape: f32[1,32], index: 7, kind: input, shape index: {}]   ;;  %s947_s9 = inlined_call_operand.vmem [shape: f32[1,32], index: 9, kind: input, shape index: {}]   ;;  %s948_s11 = inlined_call_operand.vmem [shape: f32[1,128], index: 11, kind: output, shape index: {0}]   ;;  %s949_s12 = inlined_call_operand.vmem [shape: f32[1,128], index: 12, kind: output, shape index: {1}]  }
   0x1   :  { %v56_v0 = vld [vmem:[%s937_s1] sm:$0x1]  ;;  %v53_v2 = vld [vmem:[%s938_s3 + $0x8] sm:$0xff]  ;;  %753 = vset.pattern.permute.xlu0 %v759_v3  ;;  %754 = vset.pattern.permute.xlu1 %v759_v3  ;;  %v20_v4 = vstv %s940_s10  ;;  %v54_v7 = vld [vmem:[%s938_s3 + $0x10] sm:$0xff]  ;;  %v760_v50 = vmov 0.0|0.0   ;;  %vm761_vm3 = vmmov 0  }
   0x2   :  { %v52_v1 = vld [vmem:[%s938_s3] sm:$0xff]  ;;  %659 = vmatprep.subr.msk.mxu0 %vm70_vm0, %v56_v0  ;;  %v49_v6 = vld [vmem:[%s939_s0 + $0x8] sm:$0xff]  ;;  %21 = vst [vmem:[#allocation3] sm:$0x1] %v20_v4  ;;  %v18_v8 = vstv %s941_s8  ;;  %v50_v10 = vld [vmem:[%s939_s0 + $0x10] sm:$0xff]  ;;  %v762_v51 = vmov 0.0  }
   0x3   :  { %661 = vmatprep.mubr.msk.f32.mxu0 %vm57_vm1, %v52_v1  ;;  %v48_v5 = vld [vmem:[%s939_s0] sm:$0xff]  ;;  %660 = vmatpush3.msk.msra.mxu0 %vm70_vm0, %v56_v0  ;;  %v51_v11 = vld [vmem:[%s939_s0 + $0x18] sm:$0xff]  ;;  %19 = vst [vmem:[#allocation2] sm:$0x1] %v18_v8  ;;  %v259_v15 = vld [vmem:[%s942_s4 + $0x10] sm:$0xff]  ;;  %v425_v8 = vlaneseq }
   0x4   :  { %v717_v9 = vpack.c.bf16 %v49_v6, %v48_v5  ;;  %662 = vmatmul.mubr.msk.f32.vlgmr.msra.gmra.mrb[0].mxu0 %vm57_vm1, %v53_v2  ;;  %v721_v12 = vpack.c.bf16 %v51_v11, %v50_v10  ;;  %v55_v13 = vld [vmem:[%s938_s3 + $0x18] sm:$0xff]  ;;  %v257_v14 = vld [vmem:[%s942_s4] sm:$0xff]  ;;  %273 = vperm.xlu1 %754, %v259_v15   ;;  %v258_v17 = vld [vmem:[%s942_s4 + $0x8] sm:$0xff] }
   0x5   :  { %664 = vmatprep.mubr.msk.f32.mxu0 %vm57_vm1, %v54_v7  ;;  %v44_v16 = vld [vmem:[%s943_s2] sm:$0xff]  ;;  %263 = vperm.xlu0 %753, %v257_v14   ;;  %v260_v18 = vld [vmem:[%s942_s4 + $0x18] sm:$0xff]  ;;  %v45_v19 = vld [vmem:[%s943_s2 + $0x8] sm:$0xff] }
   0x6   :  { %718 = vmatprep.subr.bf16.mxu0 %v717_v9  ;;  %v46_v20 = vld [vmem:[%s943_s2 + $0x10] sm:$0xff]  ;;  %v293_v21 = vld [vmem:[%s944_s6] sm:$0xff]  ;;  %v294_v22 = vld [vmem:[%s944_s6 + $0x8] sm:$0xff] }
   0x7   :  { %720 = vmatpush3.bf16.msra.mxu0 %v717_v9  ;;  %v47_v23 = vld [vmem:[%s943_s2 + $0x18] sm:$0xff]  ;;  %v295_v24 = vld [vmem:[%s944_s6 + $0x10] sm:$0xff]  ;;  %v289_v28 = vld [vmem:[%s945_s5] sm:$0xff]  ;;  %v426_v9 = vshrl.u32 %v425_v8, 7 }
   0x8   :  { %722 = vmatprep.subr.bf16.mxu0 %v721_v12  ;;  %665 = vmatmul.mubr.msk.f32.gmra.mrb[2].mxu0 %vm57_vm1, %v55_v13  ;;  %v296_v25 = vld [vmem:[%s944_s6 + $0x18] sm:$0xff]  ;;  %v290_v47 = vld [vmem:[%s945_s5 + $0x8] sm:$0xff]  ;;  %v291_v48 = vld [vmem:[%s945_s5 + $0x10] sm:$0xff] }
   0x9   :  { %675 = vmatprep.mubr.msk.f32.mxu0 %vm159_vm2, %v44_v16  ;;  %268 = vperm.xlu0 %753, %v258_v17   ;;  %v503_v26 = vld [vmem:[#allocation3] sm:$0x1]  ;;  %v292_v49 = vld [vmem:[%s945_s5 + $0x18] sm:$0xff]  ;;  %v418_v6 = vld [vmem:[%s946_s7] sm:$0x1]  ;;  %v427_v10 = vsub.s32 0, %v426_v9 }
   0xa   :  { %278 = vperm.xlu1 %754, %v260_v18   ;;  %v419_v27 = vld [vmem:[#allocation2] sm:$0x1]  ;;  %689 = vmatprep.mubr.msk.f32.mxu1 %vm159_vm2, %v289_v28 }
   0xb   :  { %724 = vmatpush3.bf16.msra.mxu0 %v721_v12  ;;  %v502_v7 = vld [vmem:[%s947_s9] sm:$0x1] }
   0xc   :  { %739 = vmatprep.subr.bf16.mxu0 %v760_v50 }
   0xd   :  { %299 = vperm.xlu0 %753, %v293_v21  }
   0xe   :  { %676 = vmatmul.mubr.msk.f32.vlgmr.msra.gmra.mrb[0].mxu0 %vm159_vm2, %v45_v19  ;;  %304 = vperm.xlu1 %754, %v294_v22  }
   0xf   :  { %678 = vmatprep.mubr.msk.f32.mxu0 %vm159_vm2, %v46_v20 }
  0x11   :  { %309 = vperm.xlu0 %753, %v295_v24  }
  0x12   :  { %679 = vmatmul.mubr.msk.f32.gmra.mrb[2].mxu0 %vm159_vm2, %v47_v23  ;;  %314 = vperm.xlu1 %754, %v296_v25  }
  0x13   :  { %714 = vmatprep.mubr.msk.f32.mxu0 %vm761_vm3, %v762_v51 }
  0x15   :  { %506 = vperm.xlu0 %753, %v503_v26  }
  0x16   :  { %422 = vperm.xlu1 %754, %v419_v27  }
  0x83   :  { %v274_v30 = vpop.permute.xlu1 %273 }
  0x84   :  { %v264_v29 = vpop.permute.xlu0 %263 }
  0x88   :  { %v269_v31 = vpop.permute.xlu0 %268 }
  0x89   :  { %v279_v37 = vpop.permute.xlu1 %278 }
  0x8c   :  { %v300_v53 = vpop.permute.xlu0 %299 }
  0x8d   :  { %v305_v52 = vpop.permute.xlu1 %304 }
  0x90   :  { %v310_v62 = vpop.permute.xlu0 %309 }
  0x91   :  { %v315_v59 = vpop.permute.xlu1 %314 }
  0x94   :  { %v507_v11 = vpop.permute.xlu0 %506 }
  0x95   :  { %v423_v12 = vpop.permute.xlu1 %422  ;;  %v512_v13 = vrot.slane %v507_v11, %v427_v10 }
  0x96   :  { %v428_v14 = vrot.slane %v423_v12, %v427_v10 }
  0xe1   :  { %v677_v32 = vpop.f32.mrb[0].mxu0 }
  0xe2   :  { %v282_v33 = vadd.f32 %v677_v32, %v269_v31  ;;  %v238_v34 = vpop.f32.mrb[1].mxu0 }
  0xe3   :  { %v281_v35 = vadd.f32 %v264_v29, %v238_v34 }
  0xe4   :  { %v286_v36 = vmax.f32 %v282_v33, 0.0 }
  0xe5   :  { %v285_v38 = vmax.f32 %v281_v35, 0.0  ;;  %v680_v39 = vpop.f32.mrb[2].mxu0 }
  0xe6   :  { %v284_v40 = vadd.f32 %v680_v39, %v279_v37  ;;  %v248_v41 = vpop.f32.mrb[3].mxu0 }
  0xe7   :  { %v283_v42 = vadd.f32 %v274_v30, %v248_v41  ;;  %v725_v43 = vpack.c.bf16 %v286_v36, %v285_v38 }
  0xe8   :  { %v288_v44 = vmax.f32 %v284_v40, 0.0 }
  0xe9   :  { %v287_v45 = vmax.f32 %v283_v42, 0.0  ;;  %726 = vmatprep.subr.bf16.mxu1 %v725_v43 }
  0xea   :  { %728 = vmatpush3.bf16.msra.mxu1 %v725_v43 }
  0xeb   :  { %v729_v46 = vpack.c.bf16 %v288_v44, %v287_v45 }
  0xed   :  { %730 = vmatprep.subr.bf16.mxu1 %v729_v46 }
  0xee   :  { %732 = vmatpush3.bf16.msra.mxu1 %v729_v46 }
  0xef   :  { %733 = vmatprep.subr.bf16.mxu1 %v760_v50 }
  0xf1   :  { %690 = vmatmul.mubr.msk.f32.vlgmr.msra.gmra.mrb[0].mxu1 %vm159_vm2, %v290_v47 }
  0xf2   :  { %692 = vmatprep.mubr.msk.f32.mxu1 %vm159_vm2, %v291_v48 }
  0xf5   :  { %693 = vmatmul.mubr.msk.f32.gmra.mrb[2].mxu1 %vm159_vm2, %v292_v49 }
  0xf6   :  { %703 = vmatprep.mubr.msk.f32.mxu1 %vm761_vm3, %v762_v51 }
 0x1c4   :  { %v691_v54 = vpop.f32.mrb[0].mxu1 }
 0x1c5   :  { %v401_v55 = vadd.f32 %v691_v54, %v305_v52  ;;  %v395_v56 = vpop.f32.mrb[1].mxu1 }
 0x1c6   :  { %v396_v57 = vadd.f32 %v395_v56, %v300_v53 }
 0x1c7   :  { %v415_v58 = vmax.f32 %v401_v55, 0.0 }
 0x1c8   :  { %v414_v60 = vmax.f32 %v396_v57, 0.0  ;;  %v694_v61 = vpop.f32.mrb[2].mxu1 }
 0x1c9   :  { %v411_v63 = vadd.f32 %v694_v61, %v315_v59  ;;  %v405_v0 = vpop.f32.mrb[3].mxu1 }
 0x1ca   :  { %v734_v1 = vpack.c.bf16 %v415_v58, %v414_v60  ;;  %v406_v2 = vadd.f32 %v405_v0, %v310_v62 }
 0x1cb   :  { %v417_v3 = vmax.f32 %v411_v63, 0.0 }
 0x1cc   :  { %v416_v4 = vmax.f32 %v406_v2, 0.0  ;;  %735 = vmatpush3.bf16.msra.mxu1 %v734_v1  ;;  %741 = vmatpush3.bf16.msra.mxu0 %v734_v1 }
 0x1cd   :  { %736 = vmatprep.subr.bf16.mxu1 %v760_v50  ;;  %742 = vmatprep.subr.bf16.mxu0 %v760_v50 }
 0x1ce   :  { %v737_v5 = vpack.c.bf16 %v417_v3, %v416_v4 }
 0x1d0   :  { %738 = vmatpush3.bf16.msra.mxu1 %v737_v5  ;;  %744 = vmatpush3.bf16.msra.mxu0 %v737_v5 }
 0x1d3   :  { %704 = vmatmul.mubr.msk.f32.vlgmr.msra.gmra.mrb[4].mxu1 %vm159_vm2, %v418_v6  ;;  %715 = vmatmul.mubr.msk.f32.vlgmr.msra.gmra.mrb[4].mxu0 %vm159_vm2, %v502_v7 }
 0x2a6   :  { %v498_v15 = vpop.f32.mrb[4].mxu1  ;;  %v582_v16 = vpop.f32.mrb[4].mxu0 }
 0x2a7   :  { %v499_v17 = vadd.f32 %v498_v15, %v428_v14  ;;  %v583_v18 = vadd.f32 %v582_v16, %v512_v13  ;;  %v716_v19 = vpop.f32.mrb[5].mxu0  ;;  %v705_v20 = vpop.f32.mrb[5].mxu1 }
 0x2a9   :  { %601 = vst [vmem:[%s948_s11] sm:$0x1] %v499_v17  ;;  %v587_v21 = vand.u32 2147483647, %v583_v18  ;;  %v586_v32 = vmax.f32 %v583_v18, 0.0 }
 0x2ab   :  { %v588_v22 = vsub.f32 0.0, %v587_v21 }
 0x2ad   :  { %v589_v23 = vmul.f32 1.442695, %v588_v22 }
 0x2af   :  { %755 = vpow2.f32 %v589_v23 }
 0x2b9   :  { %v756_v24 = vpop.eup %755 }
 0x2ba   :  { %v591_v25 = vadd.f32 1.0, %v756_v24  ;;  %v594_v26 = vmul.f32 -0.5, %v756_v24  ;;  %v597_v28 = vand.u32 2147483647, %v756_v24 }
 0x2bc   :  { %757 = vlog2.f32 %v591_v25  ;;  %v595_v27 = vadd.f32 1.0, %v594_v26  ;;  %vm598_vm4 = vcmp.lt.f32.partialorder %v597_v28, 0.0004427343 }
 0x2be   :  { %v596_v31 = vmul.f32 %v756_v24, %v595_v27 }
 0x2c6   :  { %v758_v29 = vpop.eup %757 }
 0x2c7   :  { %v593_v30 = vmul.f32 0.6931472, %v758_v29 }
 0x2c9   :  { %v599_v33 = vsel %vm598_vm4, %v596_v31, %v593_v30 }
 0x2ca   :  { %v600_v34 = vadd.f32 %v599_v33, %v586_v32 }
 0x2cc   :  { %v602_v35 = vmul.f32 0.9, %v600_v34 }
 0x2ce   :  { %v603_v36 = vadd.f32 0.1, %v602_v35 }
 0x2d0   :  { %604 = vst [vmem:[%s949_s12] sm:$0x1] %v603_v36 }

</bundles_post_ra>
